<compile_context>
chip_gen: v6e
topology: v6e:2x2x1
jax: 0.10.0
libtpu: 0.0.40
codegen_flags: <defaults>
</compile_context>

<pallas_src>
import functools

import jax
import jax.numpy as jnp
from jax.experimental import pallas as pl
from jax.experimental.pallas import tpu as pltpu

BN_EPS = 1e-5


def _round_up(x, m):
    return (x + m - 1) // m * m


def _double_conv_kernel(x_ref, w1_ref, b1_ref, w2_ref, b2_ref, o_ref,
                        xf1, xf2, patches, *, H, W, G, compute_dtype):
    # x_ref   : (1, Cin_p, H*W)        NCHW input, channel-padded, flattened
    # w1_ref  : (Cmid_p, 9*Cin_p)      packed conv1 weights (BN scale folded in)
    # w2_ref  : (Cout_p, 9*Cmid_p)     packed conv2 weights (BN scale folded in)
    # b1/b2   : (C, 1) f32             folded conv-bias + BN bias
    # o_ref   : (1, Cout_p, H*W)       NCHW output, flattened
    # xf1/xf2 : VMEM (Cp, PW)          flat, vertically padded halo buffers
    # patches : VMEM (9*Cp_max, H*W)   persistent im2col slab (both stages)
    HW = H * W

    # Horizontal-wrap border masks: built ONCE per grid step at (1, HW) width
    # (hoisted out of the per-stage code; broadcast inside jnp.where).
    col = jax.lax.broadcasted_iota(jnp.int32, (1, HW), 1) % W
    not_left = col != 0
    not_right = col != (W - 1)
    zero = jnp.zeros((), compute_dtype)

    def conv_stage(xf_ref, interior, w_mat, bias):
        Cp = xf_ref.shape[0]
        pw = xf_ref.shape[1]
        # Zero only the lane-aligned guard regions; the interior is fully
        # rewritten below.  (Per-step, so it is safe under megacore splits.)
        xf_ref[:, 0:G] = jnp.zeros((Cp, G), compute_dtype)
        xf_ref[:, G + HW:pw] = jnp.zeros((Cp, pw - G - HW), compute_dtype)
        # Lane-aligned interior store (G is a multiple of 128).
        xf_ref[:, G:G + HW] = interior

        # 3x3 taps as contiguous lane slices of the flat padded buffer, stored
        # into the persistent patches scratch (tap-major, channel-minor) to
        # match the host-side weight packing.  Only the horizontal wrap needs
        # masking; vertical halo rows are the zeroed guards.
        base = G - W - 1
        for t, (kh, kw) in enumerate([(kh, kw) for kh in range(3)
                                      for kw in range(3)]):
            start = base + kh * W + kw
            tap = xf_ref[:, start:start + HW]
            if kw == 0:        # needs column w-1 -> invalid at w == 0
                tap = jnp.where(not_left, tap, zero)
            elif kw == 2:      # needs column w+1 -> invalid at w == W-1
                tap = jnp.where(not_right, tap, zero)
            patches[t * Cp:(t + 1) * Cp, :] = tap

        # One MXU matmul per stage: (Cout_rows, 9*Cp) @ (9*Cp, HW), f32 acc.
        acc = jnp.dot(w_mat, patches[0:9 * Cp, :],
                      preferred_element_type=jnp.float32)
        # BN scale already folded into w_mat; only bias + ReLU remain.
        return jnp.maximum(acc + bias, 0.0)

    # Stage 1: halo built in VMEM, no wrapper-side pad.
    y1 = conv_stage(xf1, x_ref[0], w1_ref[...], b1_ref[...])        # (Cmid_p, HW) f32
    # Stage 2: intermediate never leaves VMEM.
    y2 = conv_stage(xf2, y1.astype(compute_dtype), w2_ref[...], b2_ref[...])
    o_ref[0] = y2.astype(o_ref.dtype)


def _pack_weight(w_hwio, scale, cin_p, cout_p, dtype):
    """(3,3,Cin,Cout) HWIO -> (cout_p, 9*cin_p), BN scale folded, zero-padded."""
    _, _, cin, cout = w_hwio.shape
    w = w_hwio.astype(jnp.float32) * scale[None, None, None, :]   # exact fold
    wp = jnp.zeros((3, 3, cin_p, cout_p), jnp.float32)
    wp = wp.at[:, :, :cin, :cout].set(w)
    return jnp.transpose(wp, (3, 0, 1, 2)).reshape(cout_p, 9 * cin_p).astype(dtype)


def _fold_bias(conv_bias, scale, beta, mean, c_pad):
    bias = (conv_bias - mean) * scale + beta
    return jnp.zeros((c_pad, 1), jnp.float32).at[:bias.shape[0], 0].set(bias)


def double_conv_forward(x_nchw, params, *, compute_dtype=jnp.float32):
    """x_nchw: (N, Cin, H, W). Returns (N, Cout, H, W). Fused Pallas kernel."""
    N, Cin, H, W = x_nchw.shape
    Cmid = params["w1"].shape[-1]
    Cout = params["w2"].shape[-1]
    itemsize = jnp.dtype(compute_dtype).itemsize
    pack = 8 if itemsize == 4 else 16          # sublane pack of compute dtype
    Cin_p = _round_up(Cin, pack)
    Cmid_p = _round_up(Cmid, pack)
    Cout_p = _round_up(Cout, 8)                # f32 accumulator/output rows
    HW = H * W                                 # lane-dense if multiple of 128
    G = _round_up(W + 1, 128)                  # lane-aligned interior offset
    PW = _round_up(G + HW + W + 1, 128)        # flat padded length

    # One-time parameter packing (tiny tensors, outside the hot path).
    s1 = params["g1"] / jnp.sqrt(params["v1"] + BN_EPS)
    s2 = params["g2"] / jnp.sqrt(params["v2"] + BN_EPS)
    w1 = _pack_weight(params["w1"], s1, Cin_p, Cmid_p, compute_dtype)
    w2 = _pack_weight(params["w2"], s2, Cmid_p, Cout_p, compute_dtype)
    b1 = _fold_bias(params["b1"], s1, params["beta1"], params["m1"], Cmid_p)
    b2 = _fold_bias(params["b2"], s2, params["beta2"], params["m2"], Cout_p)

    # NCHW -> (N, C, H*W) is a free row-major bitcast; zero-pad channels to
    # Cin_p and pre-cast to the compute dtype on the host.
    x_flat = jnp.zeros((N, Cin_p, HW), compute_dtype)
    x_flat = x_flat.at[:, :Cin, :].set(
        x_nchw.reshape(N, Cin, HW).astype(compute_dtype))

    kernel = functools.partial(_double_conv_kernel, H=H, W=W, G=G,
                               compute_dtype=compute_dtype)

    # VMEM budget from actual resident bytes (with margin), not a fixed 32 MiB.
    vmem_est = (2 * Cin_p * HW * itemsize              # input block (dbl-buf)
                + 2 * Cout_p * HW * 4                  # output block (dbl-buf)
                + (Cmid_p * 9 * Cin_p + Cout_p * 9 * Cmid_p) * itemsize
                + (Cmid_p + Cout_p) * 128 * 4          # biases (lane-padded)
                + (Cin_p + Cmid_p) * PW * itemsize     # halo scratch
                + 9 * max(Cin_p, Cmid_p) * HW * itemsize)  # patches scratch
    vmem_limit = int(min(64 * 1024 * 1024, max(4 * vmem_est, 16 * 1024 * 1024)))

    out_flat = pl.pallas_call(
        kernel,
        out_shape=jax.ShapeDtypeStruct((N, Cout_p, HW), jnp.float32),
        grid_spec=pltpu.PrefetchScalarGridSpec(
            num_scalar_prefetch=0,
            grid=(N,),
            in_specs=[
                pl.BlockSpec((1, Cin_p, HW), lambda n: (n, 0, 0)),
                pl.BlockSpec((Cmid_p, 9 * Cin_p), lambda n: (0, 0)),
                pl.BlockSpec((Cmid_p, 1), lambda n: (0, 0)),
                pl.BlockSpec((Cout_p, 9 * Cmid_p), lambda n: (0, 0)),
                pl.BlockSpec((Cout_p, 1), lambda n: (0, 0)),
            ],
            out_specs=pl.BlockSpec((1, Cout_p, HW), lambda n: (n, 0, 0)),
            scratch_shapes=[
                pltpu.VMEM((Cin_p, PW), compute_dtype),
                pltpu.VMEM((Cmid_p, PW), compute_dtype),
                pltpu.VMEM((9 * max(Cin_p, Cmid_p), HW), compute_dtype),
            ],
        ),
        compiler_params=pltpu.CompilerParams(
            dimension_semantics=("parallel",),
            vmem_limit_bytes=vmem_limit,
        ),
    )(x_flat, w1, b1, w2, b2)

    return out_flat[:, :Cout, :].reshape(N, Cout, H, W)  # already NCHW row-major


def reference_forward(x_nchw, params):
    """Pure-JAX reference (eval-mode BN) for correctness checking."""
    def conv_bn_relu(x, w, b, g, beta, m, v):
        x_nhwc = jnp.transpose(x, (0, 2, 3, 1))
        y = jax.lax.conv_general_dilated(
            x_nhwc, w, window_strides=(1, 1), padding="SAME",
            dimension_numbers=("NHWC", "HWIO", "NHWC"))
        y = y + b
        y = g * (y - m) / jnp.sqrt(v + BN_EPS) + beta
        y = jnp.maximum(y, 0.0)
        return jnp.transpose(y, (0, 3, 1, 2))

    y = conv_bn_relu(x_nchw, params["w1"], params["b1"], params["g1"],
                     params["beta1"], params["m1"], params["v1"])
    y = conv_bn_relu(y, params["w2"], params["b2"], params["g2"],
                     params["beta2"], params["m2"], params["v2"])
    return y


def make_params(key, in_ch, mid_ch, out_ch):
    ks = jax.random.split(key, 10)
    p = {}
    # Conv weights stored HWIO (kh, kw, cin, cout); equivalent to PyTorch OIHW.
    p["w1"] = 0.2 * jax.random.normal(ks[0], (3, 3, in_ch, mid_ch), jnp.float32)
    p["b1"] = 0.1 * jax.random.normal(ks[1], (mid_ch,), jnp.float32)
    p["g1"] = 1.0 + 0.1 * jax.random.normal(ks[2], (mid_ch,), jnp.float32)
    p["beta1"] = 0.1 * jax.random.normal(ks[3], (mid_ch,), jnp.float32)
    p["m1"] = 0.05 * jax.random.normal(ks[4], (mid_ch,), jnp.float32)
    p["v1"] = jnp.abs(1.0 + 0.1 * jax.random.normal(ks[5], (mid_ch,), jnp.float32))
    p["w2"] = 0.2 * jax.random.normal(ks[6], (3, 3, mid_ch, out_ch), jnp.float32)
    p["b2"] = 0.1 * jax.random.normal(ks[7], (out_ch,), jnp.float32)
    p["g2"] = 1.0 + 0.1 * jax.random.normal(ks[8], (out_ch,), jnp.float32)
    p["beta2"] = 0.1 * jax.random.normal(ks[9], (out_ch,), jnp.float32)
    p["m2"] = jnp.zeros((out_ch,), jnp.float32)
    p["v2"] = jnp.ones((out_ch,), jnp.float32)
    return p


if __name__ == "__main__":
    key = jax.random.PRNGKey(0)
    k_x, k_p = jax.random.split(key)

    N, C_in, H, W = 2, 4, 16, 16
    C_mid = 8   # mid_channels defaults to out_channels in the module
    C_out = 8

    x = jax.random.normal(k_x, (N, C_in, H, W), jnp.float32)  # NCHW, like PyTorch
    params = make_params(k_p, C_in, C_mid, C_out)

    ref = jax.block_until_ready(reference_forward(x, params))

    # f32 operands: exact parity with the PyTorch/f32 semantics.
    out = jax.block_until_ready(double_conv_forward(x, params))
    assert out.shape == (N, C_out, H, W)
    assert jnp.allclose(out, ref, atol=1e-4, rtol=1e-4), \
        f"f32 max err {jnp.max(jnp.abs(out - ref))}"

    # bf16 operands / f32 accumulation: the v6e/v7x MXU fast path (loose check;
    # skip on v5e where bf16 elementwise brings no benefit).
    out_bf16 = jax.block_until_ready(
        double_conv_forward(x, params, compute_dtype=jnp.bfloat16))
    assert out_bf16.shape == (N, C_out, H, W)
    assert jnp.allclose(out_bf16, ref, atol=3e-1, rtol=8e-2), \
        f"bf16 max err {jnp.max(jnp.abs(out_bf16 - ref))}"

    print("KERNEL_OK")
</pallas_src>

<mosaic_0001>
module attributes {stable_mosaic.version = 11 : i64} {
  func.func @_double_conv_kernel(%arg0: i32, %arg1: memref<1x8x256xf32, #tpu.memory_space<vmem>>, %arg2: memref<8x72xf32, #tpu.memory_space<vmem>>, %arg3: memref<8x1xf32, #tpu.memory_space<vmem>>, %arg4: memref<8x72xf32, #tpu.memory_space<vmem>>, %arg5: memref<8x1xf32, #tpu.memory_space<vmem>>, %arg6: memref<1x8x256xf32, #tpu.memory_space<vmem>>, %arg7: memref<8x512xf32, #tpu.memory_space<vmem>>, %arg8: memref<8x512xf32, #tpu.memory_space<vmem>>, %arg9: memref<72x256xf32, #tpu.memory_space<vmem>>) attributes {dimension_semantics = [#tpu.dimension_semantics<parallel>], iteration_bounds = array<i64: 2>, scalar_prefetch = 0 : i64, scratch_operands = 3 : i64, tpu.core_type = #tpu.core_type<tc>, window_params = [{transform_indices = @transform_0, window_bounds = array<i64: 1, 8, 256>}, {pipeline_mode = #tpu.pipeline_mode<synchronous>, transform_indices = @transform_1, window_bounds = array<i64: 8, 72>}, {pipeline_mode = #tpu.pipeline_mode<synchronous>, transform_indices = @transform_2, window_bounds = array<i64: 8, 1>}, {pipeline_mode = #tpu.pipeline_mode<synchronous>, transform_indices = @transform_3, window_bounds = array<i64: 8, 72>}, {pipeline_mode = #tpu.pipeline_mode<synchronous>, transform_indices = @transform_4, window_bounds = array<i64: 8, 1>}, {transform_indices = @transform_5, window_bounds = array<i64: 1, 8, 256>}]} {
    %0 = tpu.iota {dimensions = array<i32: 1>} : vector<1x256xi32>
    %c16_i32 = arith.constant 16 : i32
    %c0_i32 = arith.constant 0 : i32
    %1 = arith.cmpi eq, %c16_i32, %c0_i32 : i32
    %c1_i32 = arith.constant 1 : i32
    %2 = arith.select %1, %c1_i32, %c16_i32 : i32
    %3 = vector.broadcast %2 : i32 to vector<1x256xi32>
    %4 = arith.remsi %0, %3 : vector<1x256xi32>
    %c0_i32_0 = arith.constant 0 : i32
    %5 = vector.broadcast %c0_i32_0 : i32 to vector<1x256xi32>
    %6 = arith.cmpi ne, %4, %5 : vector<1x256xi32>
    %c0_i32_1 = arith.constant 0 : i32
    %7 = vector.broadcast %c0_i32_1 : i32 to vector<1x256xi32>
    %8 = arith.cmpi slt, %4, %7 : vector<1x256xi32>
    %c0_i32_2 = arith.constant 0 : i32
    %9 = arith.cmpi slt, %2, %c0_i32_2 : i32
    %10 = vector.broadcast %9 : i1 to vector<1x256xi1>
    %11 = vector.broadcast %10 : vector<1x256xi1> to vector<1x256xi1>
    %12 = arith.xori %8, %11 : vector<1x256xi1>
    %13 = arith.andi %12, %6 : vector<1x256xi1>
    %14 = vector.broadcast %2 : i32 to vector<1x256xi32>
    %15 = arith.addi %4, %14 : vector<1x256xi32>
    %16 = arith.select %13, %15, %4 : vector<1x256xi1>, vector<1x256xi32>
    %c0_i32_3 = arith.constant 0 : i32
    %17 = vector.broadcast %c0_i32_3 : i32 to vector<1x256xi32>
    %18 = arith.cmpi ne, %16, %17 : vector<1x256xi32>
    %c15_i32 = arith.constant 15 : i32
    %19 = vector.broadcast %c15_i32 : i32 to vector<1x256xi32>
    %20 = arith.cmpi ne, %16, %19 : vector<1x256xi32>
    %c0 = arith.constant 0 : index
    %c0_4 = arith.constant 0 : index
    %c0_5 = arith.constant 0 : index
    %21 = vector.load %arg1[%c0, %c0_4, %c0_5] : memref<1x8x256xf32, #tpu.memory_space<vmem>>, vector<1x8x256xf32>
    %22 = vector.shape_cast %21 : vector<1x8x256xf32> to vector<8x256xf32>
    %c0_6 = arith.constant 0 : index
    %c0_7 = arith.constant 0 : index
    %23 = vector.load %arg2[%c0_6, %c0_7] : memref<8x72xf32, #tpu.memory_space<vmem>>, vector<8x72xf32>
    %c0_8 = arith.constant 0 : index
    %c0_9 = arith.constant 0 : index
    %24 = vector.load %arg3[%c0_8, %c0_9] : memref<8x1xf32, #tpu.memory_space<vmem>>, vector<8x1xf32>
    %cst = arith.constant 0.000000e+00 : f32
    %25 = vector.broadcast %cst : f32 to vector<8x128xf32>
    %c0_10 = arith.constant 0 : index
    %c0_11 = arith.constant 0 : index
    %26 = vector.load %arg7[%c0_10, %c0_11] : memref<8x512xf32, #tpu.memory_space<vmem>>, vector<8x128xf32>
    tpu.vector_store %arg7[%c0_10, %c0_11], %25 {strides = array<i32>} : memref<8x512xf32, #tpu.memory_space<vmem>>, vector<8x128xf32>,
    %cst_12 = arith.constant 0.000000e+00 : f32
    %27 = vector.broadcast %cst_12 : f32 to vector<8x128xf32>
    %c0_13 = arith.constant 0 : index
    %c384 = arith.constant 384 : index
    %28 = vector.load %arg7[%c0_13, %c384] : memref<8x512xf32, #tpu.memory_space<vmem>>, vector<8x128xf32>
    tpu.vector_store %arg7[%c0_13, %c384], %27 {strides = array<i32>} : memref<8x512xf32, #tpu.memory_space<vmem>>, vector<8x128xf32>,
    %c0_14 = arith.constant 0 : index
    %c128 = arith.constant 128 : index
    %29 = vector.load %arg7[%c0_14, %c128] : memref<8x512xf32, #tpu.memory_space<vmem>>, vector<8x256xf32>
    tpu.vector_store %arg7[%c0_14, %c128], %22 {strides = array<i32>} : memref<8x512xf32, #tpu.memory_space<vmem>>, vector<8x256xf32>,
    %c0_15 = arith.constant 0 : index
    %c111 = arith.constant 111 : index
    %30 = vector.load %arg7[%c0_15, %c111] : memref<8x512xf32, #tpu.memory_space<vmem>>, vector<8x256xf32>
    %cst_16 = arith.constant 0.000000e+00 : f32
    %31 = vector.shape_cast %18 : vector<1x256xi1> to vector<1x256xi1>
    %32 = vector.broadcast %31 : vector<1x256xi1> to vector<8x256xi1>
    %33 = vector.broadcast %cst_16 : f32 to vector<8x256xf32>
    %34 = arith.select %32, %30, %33 : vector<8x256xi1>, vector<8x256xf32>
    %c0_17 = arith.constant 0 : index
    %c0_18 = arith.constant 0 : index
    %35 = vector.load %arg9[%c0_17, %c0_18] : memref<72x256xf32, #tpu.memory_space<vmem>>, vector<8x256xf32>
    tpu.vector_store %arg9[%c0_17, %c0_18], %34 {strides = array<i32>} : memref<72x256xf32, #tpu.memory_space<vmem>>, vector<8x256xf32>,
    %c0_19 = arith.constant 0 : index
    %c112 = arith.constant 112 : index
    %36 = vector.load %arg7[%c0_19, %c112] : memref<8x512xf32, #tpu.memory_space<vmem>>, vector<8x256xf32>
    %c8 = arith.constant 8 : index
    %c0_20 = arith.constant 0 : index
    %37 = vector.load %arg9[%c8, %c0_20] : memref<72x256xf32, #tpu.memory_space<vmem>>, vector<8x256xf32>
    tpu.vector_store %arg9[%c8, %c0_20], %36 {strides = array<i32>} : memref<72x256xf32, #tpu.memory_space<vmem>>, vector<8x256xf32>,
    %c0_21 = arith.constant 0 : index
    %c113 = arith.constant 113 : index
    %38 = vector.load %arg7[%c0_21, %c113] : memref<8x512xf32, #tpu.memory_space<vmem>>, vector<8x256xf32>
    %cst_22 = arith.constant 0.000000e+00 : f32
    %39 = vector.shape_cast %20 : vector<1x256xi1> to vector<1x256xi1>
    %40 = vector.broadcast %39 : vector<1x256xi1> to vector<8x256xi1>
    %41 = vector.broadcast %cst_22 : f32 to vector<8x256xf32>
    %42 = arith.select %40, %38, %41 : vector<8x256xi1>, vector<8x256xf32>
    %c16 = arith.constant 16 : index
    %c0_23 = arith.constant 0 : index
    %43 = vector.load %arg9[%c16, %c0_23] : memref<72x256xf32, #tpu.memory_space<vmem>>, vector<8x256xf32>
    tpu.vector_store %arg9[%c16, %c0_23], %42 {strides = array<i32>} : memref<72x256xf32, #tpu.memory_space<vmem>>, vector<8x256xf32>,
    %c0_24 = arith.constant 0 : index
    %c127 = arith.constant 127 : index
    %44 = vector.load %arg7[%c0_24, %c127] : memref<8x512xf32, #tpu.memory_space<vmem>>, vector<8x256xf32>
    %cst_25 = arith.constant 0.000000e+00 : f32
    %45 = vector.shape_cast %18 : vector<1x256xi1> to vector<1x256xi1>
    %46 = vector.broadcast %45 : vector<1x256xi1> to vector<8x256xi1>
    %47 = vector.broadcast %cst_25 : f32 to vector<8x256xf32>
    %48 = arith.select %46, %44, %47 : vector<8x256xi1>, vector<8x256xf32>
    %c24 = arith.constant 24 : index
    %c0_26 = arith.constant 0 : index
    %49 = vector.load %arg9[%c24, %c0_26] : memref<72x256xf32, #tpu.memory_space<vmem>>, vector<8x256xf32>
    tpu.vector_store %arg9[%c24, %c0_26], %48 {strides = array<i32>} : memref<72x256xf32, #tpu.memory_space<vmem>>, vector<8x256xf32>,
    %c0_27 = arith.constant 0 : index
    %c128_28 = arith.constant 128 : index
    %50 = vector.load %arg7[%c0_27, %c128_28] : memref<8x512xf32, #tpu.memory_space<vmem>>, vector<8x256xf32>
    %c32 = arith.constant 32 : index
    %c0_29 = arith.constant 0 : index
    %51 = vector.load %arg9[%c32, %c0_29] : memref<72x256xf32, #tpu.memory_space<vmem>>, vector<8x256xf32>
    tpu.vector_store %arg9[%c32, %c0_29], %50 {strides = array<i32>} : memref<72x256xf32, #tpu.memory_space<vmem>>, vector<8x256xf32>,
    %c0_30 = arith.constant 0 : index
    %c129 = arith.constant 129 : index
    %52 = vector.load %arg7[%c0_30, %c129] : memref<8x512xf32, #tpu.memory_space<vmem>>, vector<8x256xf32>
    %cst_31 = arith.constant 0.000000e+00 : f32
    %53 = vector.shape_cast %20 : vector<1x256xi1> to vector<1x256xi1>
    %54 = vector.broadcast %53 : vector<1x256xi1> to vector<8x256xi1>
    %55 = vector.broadcast %cst_31 : f32 to vector<8x256xf32>
    %56 = arith.select %54, %52, %55 : vector<8x256xi1>, vector<8x256xf32>
    %c40 = arith.constant 40 : index
    %c0_32 = arith.constant 0 : index
    %57 = vector.load %arg9[%c40, %c0_32] : memref<72x256xf32, #tpu.memory_space<vmem>>, vector<8x256xf32>
    tpu.vector_store %arg9[%c40, %c0_32], %56 {strides = array<i32>} : memref<72x256xf32, #tpu.memory_space<vmem>>, vector<8x256xf32>,
    %c0_33 = arith.constant 0 : index
    %c143 = arith.constant 143 : index
    %58 = vector.load %arg7[%c0_33, %c143] : memref<8x512xf32, #tpu.memory_space<vmem>>, vector<8x256xf32>
    %cst_34 = arith.constant 0.000000e+00 : f32
    %59 = vector.shape_cast %18 : vector<1x256xi1> to vector<1x256xi1>
    %60 = vector.broadcast %59 : vector<1x256xi1> to vector<8x256xi1>
    %61 = vector.broadcast %cst_34 : f32 to vector<8x256xf32>
    %62 = arith.select %60, %58, %61 : vector<8x256xi1>, vector<8x256xf32>
    %c48 = arith.constant 48 : index
    %c0_35 = arith.constant 0 : index
    %63 = vector.load %arg9[%c48, %c0_35] : memref<72x256xf32, #tpu.memory_space<vmem>>, vector<8x256xf32>
    tpu.vector_store %arg9[%c48, %c0_35], %62 {strides = array<i32>} : memref<72x256xf32, #tpu.memory_space<vmem>>, vector<8x256xf32>,
    %c0_36 = arith.constant 0 : index
    %c144 = arith.constant 144 : index
    %64 = vector.load %arg7[%c0_36, %c144] : memref<8x512xf32, #tpu.memory_space<vmem>>, vector<8x256xf32>
    %c56 = arith.constant 56 : index
    %c0_37 = arith.constant 0 : index
    %65 = vector.load %arg9[%c56, %c0_37] : memref<72x256xf32, #tpu.memory_space<vmem>>, vector<8x256xf32>
    tpu.vector_store %arg9[%c56, %c0_37], %64 {strides = array<i32>} : memref<72x256xf32, #tpu.memory_space<vmem>>, vector<8x256xf32>,
    %c0_38 = arith.constant 0 : index
    %c145 = arith.constant 145 : index
    %66 = vector.load %arg7[%c0_38, %c145] : memref<8x512xf32, #tpu.memory_space<vmem>>, vector<8x256xf32>
    %cst_39 = arith.constant 0.000000e+00 : f32
    %67 = vector.shape_cast %20 : vector<1x256xi1> to vector<1x256xi1>
    %68 = vector.broadcast %67 : vector<1x256xi1> to vector<8x256xi1>
    %69 = vector.broadcast %cst_39 : f32 to vector<8x256xf32>
    %70 = arith.select %68, %66, %69 : vector<8x256xi1>, vector<8x256xf32>
    %c64 = arith.constant 64 : index
    %c0_40 = arith.constant 0 : index
    %71 = vector.load %arg9[%c64, %c0_40] : memref<72x256xf32, #tpu.memory_space<vmem>>, vector<8x256xf32>
    tpu.vector_store %arg9[%c64, %c0_40], %70 {strides = array<i32>} : memref<72x256xf32, #tpu.memory_space<vmem>>, vector<8x256xf32>,
    %c0_41 = arith.constant 0 : index
    %c0_42 = arith.constant 0 : index
    %72 = vector.load %arg9[%c0_41, %c0_42] : memref<72x256xf32, #tpu.memory_space<vmem>>, vector<72x256xf32>
    %cst_43 = arith.constant dense<0.000000e+00> : vector<8x256xf32>
    %73 = tpu.matmul %23, %72, %cst_43 {dimension_numbers = #tpu.dot_dimension_numbers<[1], [0], [0], [1], [0, 0, 1, 1], [], []>} : vector<8x72xf32>, vector<72x256xf32>, vector<8x256xf32> -> vector<8x256xf32>
    %74 = vector.broadcast %24 : vector<8x1xf32> to vector<8x256xf32>
    %75 = arith.addf %73, %74 : vector<8x256xf32>
    %cst_44 = arith.constant 0.000000e+00 : f32
    %76 = vector.broadcast %cst_44 : f32 to vector<8x256xf32>
    %77 = arith.maximumf %75, %76 : vector<8x256xf32>
    %c0_45 = arith.constant 0 : index
    %c0_46 = arith.constant 0 : index
    %78 = vector.load %arg4[%c0_45, %c0_46] : memref<8x72xf32, #tpu.memory_space<vmem>>, vector<8x72xf32>
    %c0_47 = arith.constant 0 : index
    %c0_48 = arith.constant 0 : index
    %79 = vector.load %arg5[%c0_47, %c0_48] : memref<8x1xf32, #tpu.memory_space<vmem>>, vector<8x1xf32>
    %cst_49 = arith.constant 0.000000e+00 : f32
    %80 = vector.broadcast %cst_49 : f32 to vector<8x128xf32>
    %c0_50 = arith.constant 0 : index
    %c0_51 = arith.constant 0 : index
    %81 = vector.load %arg8[%c0_50, %c0_51] : memref<8x512xf32, #tpu.memory_space<vmem>>, vector<8x128xf32>
    tpu.vector_store %arg8[%c0_50, %c0_51], %80 {strides = array<i32>} : memref<8x512xf32, #tpu.memory_space<vmem>>, vector<8x128xf32>,
    %cst_52 = arith.constant 0.000000e+00 : f32
    %82 = vector.broadcast %cst_52 : f32 to vector<8x128xf32>
    %c0_53 = arith.constant 0 : index
    %c384_54 = arith.constant 384 : index
    %83 = vector.load %arg8[%c0_53, %c384_54] : memref<8x512xf32, #tpu.memory_space<vmem>>, vector<8x128xf32>
    tpu.vector_store %arg8[%c0_53, %c384_54], %82 {strides = array<i32>} : memref<8x512xf32, #tpu.memory_space<vmem>>, vector<8x128xf32>,
    %c0_55 = arith.constant 0 : index
    %c128_56 = arith.constant 128 : index
    %84 = vector.load %arg8[%c0_55, %c128_56] : memref<8x512xf32, #tpu.memory_space<vmem>>, vector<8x256xf32>
    tpu.vector_store %arg8[%c0_55, %c128_56], %77 {strides = array<i32>} : memref<8x512xf32, #tpu.memory_space<vmem>>, vector<8x256xf32>,
    %c0_57 = arith.constant 0 : index
    %c111_58 = arith.constant 111 : index
    %85 = vector.load %arg8[%c0_57, %c111_58] : memref<8x512xf32, #tpu.memory_space<vmem>>, vector<8x256xf32>
    %cst_59 = arith.constant 0.000000e+00 : f32
    %86 = vector.shape_cast %18 : vector<1x256xi1> to vector<1x256xi1>
    %87 = vector.broadcast %86 : vector<1x256xi1> to vector<8x256xi1>
    %88 = vector.broadcast %cst_59 : f32 to vector<8x256xf32>
    %89 = arith.select %87, %85, %88 : vector<8x256xi1>, vector<8x256xf32>
    %c0_60 = arith.constant 0 : index
    %c0_61 = arith.constant 0 : index
    %90 = vector.load %arg9[%c0_60, %c0_61] : memref<72x256xf32, #tpu.memory_space<vmem>>, vector<8x256xf32>
    tpu.vector_store %arg9[%c0_60, %c0_61], %89 {strides = array<i32>} : memref<72x256xf32, #tpu.memory_space<vmem>>, vector<8x256xf32>,
    %c0_62 = arith.constant 0 : index
    %c112_63 = arith.constant 112 : index
    %91 = vector.load %arg8[%c0_62, %c112_63] : memref<8x512xf32, #tpu.memory_space<vmem>>, vector<8x256xf32>
    %c8_64 = arith.constant 8 : index
    %c0_65 = arith.constant 0 : index
    %92 = vector.load %arg9[%c8_64, %c0_65] : memref<72x256xf32, #tpu.memory_space<vmem>>, vector<8x256xf32>
    tpu.vector_store %arg9[%c8_64, %c0_65], %91 {strides = array<i32>} : memref<72x256xf32, #tpu.memory_space<vmem>>, vector<8x256xf32>,
    %c0_66 = arith.constant 0 : index
    %c113_67 = arith.constant 113 : index
    %93 = vector.load %arg8[%c0_66, %c113_67] : memref<8x512xf32, #tpu.memory_space<vmem>>, vector<8x256xf32>
    %cst_68 = arith.constant 0.000000e+00 : f32
    %94 = vector.shape_cast %20 : vector<1x256xi1> to vector<1x256xi1>
    %95 = vector.broadcast %94 : vector<1x256xi1> to vector<8x256xi1>
    %96 = vector.broadcast %cst_68 : f32 to vector<8x256xf32>
    %97 = arith.select %95, %93, %96 : vector<8x256xi1>, vector<8x256xf32>
    %c16_69 = arith.constant 16 : index
    %c0_70 = arith.constant 0 : index
    %98 = vector.load %arg9[%c16_69, %c0_70] : memref<72x256xf32, #tpu.memory_space<vmem>>, vector<8x256xf32>
    tpu.vector_store %arg9[%c16_69, %c0_70], %97 {strides = array<i32>} : memref<72x256xf32, #tpu.memory_space<vmem>>, vector<8x256xf32>,
    %c0_71 = arith.constant 0 : index
    %c127_72 = arith.constant 127 : index
    %99 = vector.load %arg8[%c0_71, %c127_72] : memref<8x512xf32, #tpu.memory_space<vmem>>, vector<8x256xf32>
    %cst_73 = arith.constant 0.000000e+00 : f32
    %100 = vector.shape_cast %18 : vector<1x256xi1> to vector<1x256xi1>
    %101 = vector.broadcast %100 : vector<1x256xi1> to vector<8x256xi1>
    %102 = vector.broadcast %cst_73 : f32 to vector<8x256xf32>
    %103 = arith.select %101, %99, %102 : vector<8x256xi1>, vector<8x256xf32>
    %c24_74 = arith.constant 24 : index
    %c0_75 = arith.constant 0 : index
    %104 = vector.load %arg9[%c24_74, %c0_75] : memref<72x256xf32, #tpu.memory_space<vmem>>, vector<8x256xf32>
    tpu.vector_store %arg9[%c24_74, %c0_75], %103 {strides = array<i32>} : memref<72x256xf32, #tpu.memory_space<vmem>>, vector<8x256xf32>,
    %c0_76 = arith.constant 0 : index
    %c128_77 = arith.constant 128 : index
    %105 = vector.load %arg8[%c0_76, %c128_77] : memref<8x512xf32, #tpu.memory_space<vmem>>, vector<8x256xf32>
    %c32_78 = arith.constant 32 : index
    %c0_79 = arith.constant 0 : index
    %106 = vector.load %arg9[%c32_78, %c0_79] : memref<72x256xf32, #tpu.memory_space<vmem>>, vector<8x256xf32>
    tpu.vector_store %arg9[%c32_78, %c0_79], %105 {strides = array<i32>} : memref<72x256xf32, #tpu.memory_space<vmem>>, vector<8x256xf32>,
    %c0_80 = arith.constant 0 : index
    %c129_81 = arith.constant 129 : index
    %107 = vector.load %arg8[%c0_80, %c129_81] : memref<8x512xf32, #tpu.memory_space<vmem>>, vector<8x256xf32>
    %cst_82 = arith.constant 0.000000e+00 : f32
    %108 = vector.shape_cast %20 : vector<1x256xi1> to vector<1x256xi1>
    %109 = vector.broadcast %108 : vector<1x256xi1> to vector<8x256xi1>
    %110 = vector.broadcast %cst_82 : f32 to vector<8x256xf32>
    %111 = arith.select %109, %107, %110 : vector<8x256xi1>, vector<8x256xf32>
    %c40_83 = arith.constant 40 : index
    %c0_84 = arith.constant 0 : index
    %112 = vector.load %arg9[%c40_83, %c0_84] : memref<72x256xf32, #tpu.memory_space<vmem>>, vector<8x256xf32>
    tpu.vector_store %arg9[%c40_83, %c0_84], %111 {strides = array<i32>} : memref<72x256xf32, #tpu.memory_space<vmem>>, vector<8x256xf32>,
    %c0_85 = arith.constant 0 : index
    %c143_86 = arith.constant 143 : index
    %113 = vector.load %arg8[%c0_85, %c143_86] : memref<8x512xf32, #tpu.memory_space<vmem>>, vector<8x256xf32>
    %cst_87 = arith.constant 0.000000e+00 : f32
    %114 = vector.shape_cast %18 : vector<1x256xi1> to vector<1x256xi1>
    %115 = vector.broadcast %114 : vector<1x256xi1> to vector<8x256xi1>
    %116 = vector.broadcast %cst_87 : f32 to vector<8x256xf32>
    %117 = arith.select %115, %113, %116 : vector<8x256xi1>, vector<8x256xf32>
    %c48_88 = arith.constant 48 : index
    %c0_89 = arith.constant 0 : index
    %118 = vector.load %arg9[%c48_88, %c0_89] : memref<72x256xf32, #tpu.memory_space<vmem>>, vector<8x256xf32>
    tpu.vector_store %arg9[%c48_88, %c0_89], %117 {strides = array<i32>} : memref<72x256xf32, #tpu.memory_space<vmem>>, vector<8x256xf32>,
    %c0_90 = arith.constant 0 : index
    %c144_91 = arith.constant 144 : index
    %119 = vector.load %arg8[%c0_90, %c144_91] : memref<8x512xf32, #tpu.memory_space<vmem>>, vector<8x256xf32>
    %c56_92 = arith.constant 56 : index
    %c0_93 = arith.constant 0 : index
    %120 = vector.load %arg9[%c56_92, %c0_93] : memref<72x256xf32, #tpu.memory_space<vmem>>, vector<8x256xf32>
    tpu.vector_store %arg9[%c56_92, %c0_93], %119 {strides = array<i32>} : memref<72x256xf32, #tpu.memory_space<vmem>>, vector<8x256xf32>,
    %c0_94 = arith.constant 0 : index
    %c145_95 = arith.constant 145 : index
    %121 = vector.load %arg8[%c0_94, %c145_95] : memref<8x512xf32, #tpu.memory_space<vmem>>, vector<8x256xf32>
    %cst_96 = arith.constant 0.000000e+00 : f32
    %122 = vector.shape_cast %20 : vector<1x256xi1> to vector<1x256xi1>
    %123 = vector.broadcast %122 : vector<1x256xi1> to vector<8x256xi1>
    %124 = vector.broadcast %cst_96 : f32 to vector<8x256xf32>
    %125 = arith.select %123, %121, %124 : vector<8x256xi1>, vector<8x256xf32>
    %c64_97 = arith.constant 64 : index
    %c0_98 = arith.constant 0 : index
    %126 = vector.load %arg9[%c64_97, %c0_98] : memref<72x256xf32, #tpu.memory_space<vmem>>, vector<8x256xf32>
    tpu.vector_store %arg9[%c64_97, %c0_98], %125 {strides = array<i32>} : memref<72x256xf32, #tpu.memory_space<vmem>>, vector<8x256xf32>,
    %c0_99 = arith.constant 0 : index
    %c0_100 = arith.constant 0 : index
    %127 = vector.load %arg9[%c0_99, %c0_100] : memref<72x256xf32, #tpu.memory_space<vmem>>, vector<72x256xf32>
    %cst_101 = arith.constant dense<0.000000e+00> : vector<8x256xf32>
    %128 = tpu.matmul %78, %127, %cst_101 {dimension_numbers = #tpu.dot_dimension_numbers<[1], [0], [0], [1], [0, 0, 1, 1], [], []>} : vector<8x72xf32>, vector<72x256xf32>, vector<8x256xf32> -> vector<8x256xf32>
    %129 = vector.broadcast %79 : vector<8x1xf32> to vector<8x256xf32>
    %130 = arith.addf %128, %129 : vector<8x256xf32>
    %cst_102 = arith.constant 0.000000e+00 : f32
    %131 = vector.broadcast %cst_102 : f32 to vector<8x256xf32>
    %132 = arith.maximumf %130, %131 : vector<8x256xf32>
    %c0_103 = arith.constant 0 : index
    %c0_104 = arith.constant 0 : index
    %c0_105 = arith.constant 0 : index
    %133 = vector.load %arg6[%c0_103, %c0_104, %c0_105] : memref<1x8x256xf32, #tpu.memory_space<vmem>>, vector<1x8x256xf32>
    %134 = vector.shape_cast %133 : vector<1x8x256xf32> to vector<8x256xf32>
    %135 = vector.shape_cast %132 : vector<8x256xf32> to vector<1x8x256xf32>
    tpu.vector_store %arg6[%c0_103, %c0_104, %c0_105], %135 {strides = array<i32>} : memref<1x8x256xf32, #tpu.memory_space<vmem>>, vector<1x8x256xf32>,
    return
  }
  func.func @transform_0(%arg0: i32) -> (i32, i32, i32) {
    %c0_i32 = arith.constant 0 : i32
    %c0_i32_0 = arith.constant 0 : i32
    %c0_i32_1 = arith.constant 0 : i32
    return %arg0, %c0_i32, %c0_i32_0 : i32, i32, i32
  }
  func.func @transform_1(%arg0: i32) -> (i32, i32) {
    %c0_i32 = arith.constant 0 : i32
    %c0_i32_0 = arith.constant 0 : i32
    %c0_i32_1 = arith.constant 0 : i32
    return %c0_i32, %c0_i32_0 : i32, i32
  }
  func.func @transform_2(%arg0: i32) -> (i32, i32) {
    %c0_i32 = arith.constant 0 : i32
    %c0_i32_0 = arith.constant 0 : i32
    %c0_i32_1 = arith.constant 0 : i32
    return %c0_i32, %c0_i32_0 : i32, i32
  }
  func.func @transform_3(%arg0: i32) -> (i32, i32) {
    %c0_i32 = arith.constant 0 : i32
    %c0_i32_0 = arith.constant 0 : i32
    %c0_i32_1 = arith.constant 0 : i32
    return %c0_i32, %c0_i32_0 : i32, i32
  }
  func.func @transform_4(%arg0: i32) -> (i32, i32) {
    %c0_i32 = arith.constant 0 : i32
    %c0_i32_0 = arith.constant 0 : i32
    %c0_i32_1 = arith.constant 0 : i32
    return %c0_i32, %c0_i32_0 : i32, i32
  }
  func.func @transform_5(%arg0: i32) -> (i32, i32, i32) {
    %c0_i32 = arith.constant 0 : i32
    %c0_i32_0 = arith.constant 0 : i32
    %c0_i32_1 = arith.constant 0 : i32
    return %arg0, %c0_i32, %c0_i32_0 : i32, i32, i32
  }
}

</mosaic_0001>

<bundles_post_ra>
// kernel: tpu_custom_call.1
= control target key start
LH: loop header
LB: loop body
LE: loop exit
PB: predicated region body
PF: predicated region fallthrough
CT: control target
= control target key end

     0   :  { %10 = vsyncpa [#allocation6], 0  ;;  %s1497_s0 = inlined_call_operand.hbm [shape: f32[2,8,256], index: 0, kind: input, shape index: {}]   ;;  %s1498_s1 = inlined_call_operand.vmem [shape: f32[8,72], index: 1, kind: input, shape index: {}]   ;;  %s1499_s2 = inlined_call_operand.vmem [shape: f32[8,1], index: 2, kind: input, shape index: {}]   ;;  %s1500_s3 = inlined_call_operand.vmem [shape: f32[8,72], index: 3, kind: input, shape index: {}]   ;;  %s1501_s4 = inlined_call_operand.vmem [shape: f32[8,1], index: 4, kind: input, shape index: {}]   ;;  %s1502_s5 = inlined_call_operand.hbm [shape: f32[2,8,256], index: 5, kind: output, shape index: {}]  }
   0x1   :  { %12 = vsyncpa [#allocation6 + $0x1], 0 }
   0x2   :  { %13 = vsyncpa [#allocation7], 0 }
   0x3   :  { %15 = vsyncpa [#allocation7 + $0x1], 0  ;;  %s1143_s18 = smov 0   ;;  %s1145_s19 = smov 0  }
   0x4   :  { %s1147_s20 = smov 0   ;;  %s1149_s21 = smov 0  }
   0x5 LB: > { %s1164_s22 = sadd.s32 4294967295, %s1099_s21   ;;  %s908_s23 = sadd.s32 4294967294, %s1099_s21   ;;  %s1099_s21 = sphi %s1149_s21, %s1527_s21   ;;  %s1095_s20 = sphi %s1147_s20, %s1526_s20   ;;  %s1091_s19 = sphi %s1145_s19, %s1525_s19   ;;  %s1087_s18 = sphi %s1143_s18, %s1524_s18  }
   0x6   : > { %s1168_s24 = sadd.s32 1, %s1099_s21   ;;  %s28_s25 = sadd.s32 1, %s1095_s20 }
   0x7   : > { %s25_s26 = ssub.s32 %s1099_s21, %s1168_s24  ;;  %p35_p0 = scmp.ne.s32.totalorder %s1095_s20, %s1091_s19 }
   0x8   : > { %p26_p1 = scmp.eq.s32.totalorder %s25_s26, 0  ;;  %p36_p2 = scmp.eq.s32.totalorder %s1099_s21, 0 }
   0x9   : > { %p41_p3 = scmp.ne.s32.totalorder %s1091_s19, %s1087_s18  ;;  %p42_p4 = scmp.eq.s32.totalorder %s1164_s22, 0 }
   0xa   : > { %s1180_s27 = scalar_select %p26_p1, %s1095_s20, %s28_s25  }
   0xb   : > { %p1182_p5 = por %p36_p2, %p35_p0  ;;  %p1186_p6 = por %p42_p4, %p41_p3 }
   0xc   : > { %p149_p7 = scmp.eq.s32.totalorder %s1164_s22, 1  ;;  %p155_p8 = scmp.eq.s32.totalorder %s908_s23, 1 }
   0xd   : > { %s1506_s29 = scalar_select %p1186_p6, 1, 0 }
   0xe   : > { %p962_p10 = scmp.lt.s32.totalorder %s1099_s21, 2  ;;  %p1193_p11 = por %p149_p7, %p35_p0 }
   0xf   : > { %p1197_p12 = por %p155_p8, %p41_p3  ;;  %s187_s7 = sand.u32 1, %s1095_s20  }
  0x10   : > { %s1507_s30 = scalar_select %p1193_p11, 1, 0 }
  0x11   : > { %s1508_s6 = scalar_select %p1197_p12, 1, 0 }
  0x12   : > { %s924_s8 = sshll.u32 %s1099_s21, 8  ;;  %s911_s9 = sshll.u32 %s187_s7, 4 }
  0x13   : > { %s1206_s12 = scalar_lea.hbm %s1497_s0, %s924_s8  ;;  %s191_s13 = scalar_lea.vmem [#allocation5], %s911_s9 }
  0x14   : > { %s199_s14 = sshll.u32 %s191_s13, 4  ;;  %p1210_p13 = pnand %p962_p10, %p1182_p5  ;;  %s1214_s14 = int_to_ptr.vmem [resolvable:$true] %s199_s14 }
  0x15   : > { %s188_s16 = scalar_lea.sflag [#allocation6], %s187_s7  ;;  %s1007_s17 = scalar_lea.hbm %s1206_s12, 256 }
  0x16   : > { %p1008_p2 = scmp.ne.s32.totalorder %s1206_s12, %s1007_s17  ;;  %p1009_p3 = pneg %p1210_p13 }
  0x17   : > { %s1012_s26 = scalar_lea.hbm %s1497_s0, 512  ;;  %p1013_p5 = scmp.lt.s32.totalorder %s1206_s12, %s1497_s0 }
  0x18   : > { %p1010_p4 = pnand %p1009_p3, %p1008_p2  ;;  %p1014_p8 = scmp.lt.s32.totalorder %s1012_s26, %s1007_s17 }
  0x1a   : > { %p1011_p7 = pneg %p1010_p4  ;;  %p1015_p10 = por %p1014_p8, %p1013_p5 }
  0x1c   : > { %p1016_p9 = pnand %p1015_p10, %p1011_p7 }
  0x1e   : > { %1019 = shalt.err (!%p1016_p9)
}
  0x1f   : > { %s1020_s7 = scalar_lea.vmem %s1214_s14, 256  ;;  %s1101_s9 = smov [#allocation5]  }
  0x20   : > { %p1021_p0 = scmp.ne.s32.totalorder %s1214_s14, %s1020_s7  ;;  %s1025_s10 = sshll.u32 %s1101_s9, 4  ;;  %s1026_s10 = int_to_ptr.vmem [resolvable:$false] %s1025_s10 }
  0x21   : > { %s1027_s11 = scalar_lea.vmem %s1026_s10, 512  ;;  %p1028_p4 = scmp.lt.s32.totalorder %s1214_s14, %s1026_s10 }
  0x22   : > { %p1023_p1 = pnand %p1021_p0, %p1009_p3  ;;  %p1029_p12 = scmp.lt.s32.totalorder %s1027_s11, %s1020_s7 }
  0x24   : > { %p1024_p2 = pneg %p1023_p1  ;;  %p1030_p11 = por %p1029_p12, %p1028_p4 }
  0x26   : > { %p1031_p6 = pnand %p1030_p11, %p1024_p2 }
  0x28   : > { %1034 = shalt.err (!%p1031_p6)
}
  0x29   : > { %957 = dma.hbm_to_vmem [thread:$0]  (!%p1210_p13), %s1206_s12, 256, %s1214_s14, %s188_s16  }
  0x2a   : > { %p1510_p9 = scmp.lt.s32.totalorder %s1099_s21, 3  ;;  %p1511_p7 = scmp.ge.s32.totalorder %s1099_s21, 1 }
  0x2c   : > { %p205_p0 = pnand %p1511_p7, %p1510_p9 }
  0x2d   : > { %s1241_s13 = sand.u32 (!%p205_p0), 1, %s1091_s19   ;;  %p1512_p6 = scmp.ne.s32.totalorder (!%p205_p0), %s1506_s29, 0 }
  0x2e   : > { %208 = sbr.rel (%p205_p0) target bundleno = 777 (0x309), region = 40  ;;  %s915_s17 = sshll.u32 (!%p205_p0), %s1241_s13, 4 }
  0x2f   : > { %s211_s23 = scalar_lea.sflag (!%p205_p0), [#allocation6], %s1241_s13  ;;  %s214_s15 = scalar_lea.vmem (!%p205_p0), [#allocation5], %s915_s17 }
  0x33   : > { %1078 = dma.done.wait (%p1512_p6), %s211_s23, 256  }
  0x34   : > { %1080 = vsyncadd (%p1512_p6), %s211_s23, 4294967040  ;;  %v1102_v0 = vmov 0.0   ;;  %s1103_s12 = smov 111   ;;  %s1104_s14 = smov 112   ;;  %v1257_v1 = vld [vmem:[%s214_s15] sm:$0xff]  ;;  %v1259_v2 = vld [vmem:[%s214_s15 + $0x8] sm:$0xff]  ;;  %v241_v5 = vlaneseq }
  0x35   : > { %445 = vrot.lane.b32.xlu0 %v1102_v0, %s1103_s12  ;;  %547 = vmatprep.mubr.f32.mxu0 %v1102_v0  ;;  %s1105_s29 = smov 113   ;;  %s1106_s16 = smov 127   ;;  %v1110_v3 = vmov 0   ;;  %v275_v4 = vld [vmem:[%s1499_s2] sm:$0xff]  ;;  %vm447_vm0 = vcmask 908288   ;;  %vm428_vm3 = vcmask 916480  }
  0x36   : > { %812 = vmatprep.mubr.f32.mxu1 %v1102_v0  ;;  %441 = vrot.lane.b32.xlu1 %v1257_v1, %s1103_s12  ;;  %s1107_s25 = smov 1   ;;  %s1108_s26 = smov 15   ;;  %v242_v6 = vand.u32 127, %v241_v5  ;;  %vm407_vm4 = vcmask 924672   ;;  %vm386_vm7 = vcmask 1039360   ;;  %vm361_vm8 = vcmask 7168  }
  0x37   : > { %s1109_s28 = smov 16   ;;  %1006 = vset.pattern.permute.xlu0 %v1110_v3  ;;  %s1111_s8 = smov 17   ;;  %vm340_vm9 = vcmask 121856   ;;  %vm317_vm10 = vcmask 130048   ;;  %vm296_vm11 = vcmask 138240   ;;  %v274_v53 = vld [vmem:[%s1498_s1] sm:$0xff] }
  0x38   : > { %v243_v7 = vadd.s32 128, %v242_v6  ;;  %v248_v11 = vand.u32 15, %v242_v6  ;;  %vm479_vm12 = vcmask 588800   ;;  %v557_v62 = vld [vmem:[%s1501_s4] sm:$0xff]  ;;  %s824_s7 = scalar_lea.sflag [#allocation7], %s1241_s13  ;;  %p1521_p12 = scmp.ne.s32.totalorder %s1507_s30, 0 }
  0x39   : > { %426 = vrot.lane.b32.xlu0 %v1102_v0, %s1104_s14  ;;  %v556_v13 = vld [vmem:[%s1500_s3] sm:$0xff] }
  0x3a   : > { %424 = vrot.lane.b32.xlu1 %v1259_v2, %s1104_s14  ;;  %v255_v9 = vand.u32 15, %v243_v7  ;;  %vm1324_vm2 = vcmp.ne.s32.totalorder %v248_v11, 15  ;;  %vm1340_vm6 = vcmp.ne.s32.totalorder %v248_v11, 0 }
  0x3c   : > { %vm1320_vm1 = vcmp.ne.s32.totalorder %v255_v9, 15  ;;  %vm1336_vm5 = vcmp.ne.s32.totalorder %v255_v9, 0 }
  0x3d   : > { %443 = vrot.lane.b32.xlu0 %v1259_v2, %s1103_s12 }
  0x3e   : > { %422 = vrot.lane.b32.xlu1 %v1257_v1, %s1104_s14 }
  0x41   : > { %403 = vrot.lane.b32.xlu0 %v1259_v2, %s1105_s29 }
  0x42   : > { %405 = vrot.lane.b32.xlu1 %v1102_v0, %s1105_s29 }
  0x45   : > { %401 = vrot.lane.b32.xlu0 %v1257_v1, %s1105_s29 }
  0x46   : > { %382 = vrot.lane.b32.xlu1 %v1259_v2, %s1106_s16 }
  0x49   : > { %384 = vrot.lane.b32.xlu0 %v1102_v0, %s1106_s16 }
  0x4a   : > { %380 = vrot.lane.b32.xlu1 %v1257_v1, %s1106_s16 }
  0x4d   : > { %357 = vrot.lane.b32.xlu0 %v1257_v1, %s1107_s25 }
  0x4e   : > { %359 = vrot.lane.b32.xlu1 %v1259_v2, %s1107_s25 }
  0x51   : > { %355 = vrot.lane.b32.xlu0 %v1102_v0, %s1107_s25 }
  0x52   : > { %336 = vrot.lane.b32.xlu1 %v1257_v1, %s1108_s26 }
  0x55   : > { %338 = vrot.lane.b32.xlu0 %v1259_v2, %s1108_s26 }
  0x56   : > { %334 = vrot.lane.b32.xlu1 %v1102_v0, %s1108_s26 }
  0x59   : > { %313 = vrot.lane.b32.xlu0 %v1257_v1, %s1109_s28 }
  0x5a   : > { %315 = vrot.lane.b32.xlu1 %v1259_v2, %s1109_s28 }
  0x5d   : > { %311 = vrot.lane.b32.xlu0 %v1102_v0, %s1109_s28 }
  0x5e   : > { %292 = vrot.lane.b32.xlu1 %v1257_v1, %s1111_s8 }
  0x61   : > { %294 = vrot.lane.b32.xlu0 %v1259_v2, %s1111_s8 }
  0x62   : > { %290 = vrot.lane.b32.xlu1 %v1102_v0, %s1111_s8 }
  0x65   : > { %476 = vperm.xlu0 %1006, %v275_v4  }
  0x66   : > { %712 = vrot.lane.b32.xlu1 %v1102_v0, %s1103_s12 }
  0x69   : > { %694 = vrot.lane.b32.xlu0 %v1102_v0, %s1104_s14 }
  0x6a   : > { %674 = vrot.lane.b32.xlu1 %v1102_v0, %s1105_s29 }
  0x6d   : > { %654 = vrot.lane.b32.xlu0 %v1102_v0, %s1106_s16 }
  0x6e   : > { %606 = vrot.lane.b32.xlu1 %v1102_v0, %s1108_s26 }
  0x71   : > { %626 = vrot.lane.b32.xlu0 %v1102_v0, %s1107_s25 }
  0xa7   : > { %v446_v8 = vpop.permute.xlu0 %445 }
  0xa8   : > { %v442_v12 = vpop.permute.xlu1 %441 }
  0xab   : > { %v427_v10 = vpop.permute.xlu0 %426 }
  0xac   : > { %v425_v18 = vpop.permute.xlu1 %424 }
  0xad   : > { %v430_v19 = vsel %vm428_vm3, %v425_v18, %v427_v10 }
  0xaf   : > { %v444_v14 = vpop.permute.xlu0 %443 }
  0xb0   : > { %v449_v16 = vsel %vm447_vm0, %v444_v14, %v446_v8  ;;  %v448_v17 = vsel %vm447_vm0, %v442_v12, %v444_v14  ;;  %v423_v21 = vpop.permute.xlu1 %422 }
  0xb1   : > { %926 = vmatprep.subr.msk.mxu0 %vm1320_vm1, %v449_v16  ;;  %v429_v22 = vsel %vm428_vm3, %v423_v21, %v425_v18 }
  0xb2   : > { %927 = vmatpush1.msk.msra.mxu0 %vm1324_vm2, %v448_v17 }
  0xb3   : > { %v404_v20 = vpop.permute.xlu0 %403  ;;  %499 = vmatprep.subr.mxu0 %v430_v19 }
  0xb4   : > { %500 = vmatpush1.msra.mxu0 %v429_v22  ;;  %v406_v25 = vpop.permute.xlu1 %405 }
  0xb5   : > { %v409_v27 = vsel %vm407_vm4, %v404_v20, %v406_v25 }
  0xb6   : > { %928 = vmatprep.subr.msk.mxu0 %vm1336_vm5, %v409_v27 }
  0xb7   : > { %v402_v23 = vpop.permute.xlu0 %401 }
  0xb8   : > { %v408_v29 = vsel %vm407_vm4, %v402_v23, %v404_v20  ;;  %v383_v30 = vpop.permute.xlu1 %382 }
  0xb9   : > { %929 = vmatpush1.msk.msra.mxu0 %vm1340_vm6, %v408_v29 }
  0xbb   : > { %v385_v28 = vpop.permute.xlu0 %384 }
  0xbc   : > { %v388_v31 = vsel %vm386_vm7, %v383_v30, %v385_v28  ;;  %v381_v33 = vpop.permute.xlu1 %380 }
  0xbd   : > { %930 = vmatprep.subr.msk.mxu0 %vm1320_vm1, %v388_v31  ;;  %v387_v34 = vsel %vm386_vm7, %v381_v33, %v383_v30 }
  0xbe   : > { %931 = vmatpush1.msk.msra.mxu0 %vm1324_vm2, %v387_v34 }
  0xbf   : > { %v358_v32 = vpop.permute.xlu0 %357  ;;  %505 = vmatprep.subr.mxu0 %v1259_v2 }
  0xc0   : > { %v360_v36 = vpop.permute.xlu1 %359  ;;  %506 = vmatpush1.msra.mxu0 %v1257_v1 }
  0xc1   : > { %v363_v37 = vsel %vm361_vm8, %v358_v32, %v360_v36 }
  0xc2   : > { %932 = vmatprep.subr.msk.mxu0 %vm1336_vm5, %v363_v37 }
  0xc3   : > { %v356_v35 = vpop.permute.xlu0 %355 }
  0xc4   : > { %v362_v39 = vsel %vm361_vm8, %v356_v35, %v358_v32  ;;  %v337_v40 = vpop.permute.xlu1 %336 }
  0xc5   : > { %933 = vmatpush1.msk.msra.mxu0 %vm1340_vm6, %v362_v39 }
  0xc7   : > { %v339_v38 = vpop.permute.xlu0 %338 }
  0xc8   : > { %v342_v41 = vsel %vm340_vm9, %v337_v40, %v339_v38  ;;  %v335_v43 = vpop.permute.xlu1 %334 }
  0xc9   : > { %934 = vmatprep.subr.msk.mxu0 %vm1320_vm1, %v342_v41  ;;  %v341_v44 = vsel %vm340_vm9, %v335_v43, %v337_v40 }
  0xca   : > { %935 = vmatpush1.msk.msra.mxu0 %vm1324_vm2, %v341_v44 }
  0xcb   : > { %v314_v42 = vpop.permute.xlu0 %313 }
  0xcc   : > { %v316_v46 = vpop.permute.xlu1 %315 }
  0xcd   : > { %v319_v47 = vsel %vm317_vm10, %v314_v42, %v316_v46 }
  0xce   : > { %511 = vmatprep.subr.mxu0 %v319_v47 }
  0xcf   : > { %v312_v45 = vpop.permute.xlu0 %311 }
  0xd0   : > { %v318_v48 = vsel %vm317_vm10, %v312_v45, %v314_v42  ;;  %v293_v50 = vpop.permute.xlu1 %292 }
  0xd1   : > { %512 = vmatpush1.msra.mxu0 %v318_v48 }
  0xd3   : > { %v295_v49 = vpop.permute.xlu0 %294 }
  0xd4   : > { %v298_v51 = vsel %vm296_vm11, %v293_v50, %v295_v49  ;;  %v291_v52 = vpop.permute.xlu1 %290 }
  0xd5   : > { %936 = vmatprep.subr.msk.mxu0 %vm1336_vm5, %v298_v51  ;;  %v297_v54 = vsel %vm296_vm11, %v291_v52, %v293_v50 }
  0xd6   : > { %937 = vmatpush1.msk.msra.mxu0 %vm1340_vm6, %v297_v54 }
  0xd7   : > { %917 = vmatmul.mubr.msk.f32.vlgmr.msra.gmra.mxu0 %vm479_vm12, %v274_v53 }
  0xd8   : > { %v713_v1 = vpop.permute.xlu1 %712 }
  0xdc   : > { %v675_v3 = vpop.permute.xlu1 %674 }
  0xe0   : > { %v477_v55 = vpop.permute.xlu0 %476  ;;  %v607_v5 = vpop.permute.xlu1 %606 }
  0xe4   : > { %v695_v63 = vpop.permute.xlu0 %694 }
  0xe8   : > { %v655_v2 = vpop.permute.xlu0 %654 }
  0xec   : > { %v627_v4 = vpop.permute.xlu0 %626 }
 0x197   : > { %v549_v56 = vpop.f32.mrf.mxu0 }
 0x198   : > { %v550_v57 = vadd.f32 %v549_v56, %v477_v55 }
 0x199   : > { %v551_v59 = vpop.f32.mrf.mxu0 }
 0x19a   : > { %v1382_v58 = vmax.f32 %v550_v57, 0.0  ;;  %v552_v60 = vadd.f32 %v551_v59, %v477_v55 }
 0x19c   : > { %690 = vrot.lane.b32.xlu1 %v1382_v58, %s1104_s14  ;;  %708 = vrot.lane.b32.xlu0 %v1382_v58, %s1103_s12  ;;  %v555_v61 = vmax.f32 %v552_v60, 0.0 }
 0x1a0   : > { %650 = vrot.lane.b32.xlu1 %v1382_v58, %s1106_s16  ;;  %670 = vrot.lane.b32.xlu0 %v1382_v58, %s1105_s29 }
 0x1a4   : > { %608 = vrot.lane.b32.xlu1 %v1382_v58, %s1108_s26  ;;  %628 = vrot.lane.b32.xlu0 %v1382_v58, %s1107_s25 }
 0x1a8   : > { %710 = vrot.lane.b32.xlu1 %v555_v61, %s1103_s12  ;;  %590 = vrot.lane.b32.xlu0 %v1382_v58, %s1109_s28 }
 0x1ac   : > { %692 = vrot.lane.b32.xlu1 %v555_v61, %s1104_s14  ;;  %672 = vrot.lane.b32.xlu0 %v555_v61, %s1105_s29  ;;  %s925_s29 = sshll.u32 %s1164_s22, 8  ;;  %s1112_s22 = smov [#allocation8]  }
 0x1ad   : > { %s1039_s10 = sshll.u32 %s1112_s22, 4  ;;  %s1040_s10 = int_to_ptr.vmem [resolvable:$false] %s1039_s10 }
 0x1b0   : > { %570 = vrot.lane.b32.xlu1 %v1382_v58, %s1111_s8  ;;  %588 = vrot.lane.b32.xlu0 %v1102_v0, %s1109_s28 }
 0x1b4   : > { %652 = vrot.lane.b32.xlu1 %v555_v61, %s1106_s16  ;;  %610 = vrot.lane.b32.xlu0 %v555_v61, %s1108_s26  ;;  %s240_s16 = scalar_lea.vmem [#allocation8], %s915_s17  ;;  %s1041_s17 = scalar_lea.vmem %s1040_s10, 512 }
 0x1b8   : > { %630 = vrot.lane.b32.xlu1 %v555_v61, %s1107_s25  ;;  %572 = vrot.lane.b32.xlu0 %v555_v61, %s1111_s8  ;;  %s838_s25 = sshll.u32 %s240_s16, 4  ;;  %s839_s25 = int_to_ptr.vmem [resolvable:$true] %s838_s25 }
 0x1b9   : > { %s1035_s9 = scalar_lea.vmem %s839_s25, 256  ;;  %p1042_p3 = scmp.lt.s32.totalorder %s839_s25, %s1040_s10 }
 0x1ba   : > { %p1036_p11 = scmp.ne.s32.totalorder %s839_s25, %s1035_s9  ;;  %p1043_p5 = scmp.lt.s32.totalorder %s1041_s17, %s1035_s9 }
 0x1bc   : > { %592 = vrot.lane.b32.xlu1 %v555_v61, %s1109_s28  ;;  %742 = vperm.xlu0 %1006, %v557_v62   ;;  %p1037_p13 = pnand %p1036_p11, %p1521_p12  ;;  %p1044_p8 = por %p1043_p5, %p1042_p3 }
 0x1be   : > { %p1038_p1 = pneg %p1037_p13 }
 0x1c0   : > { %568 = vrot.lane.b32.xlu1 %v1102_v0, %s1111_s8  ;;  %s836_s8 = scalar_lea.hbm %s1502_s5, %s925_s29  ;;  %p1045_p10 = pnand %p1044_p8, %p1038_p1 }
 0x20e   : > { %v709_v6 = vpop.permute.xlu0 %708  ;;  %v691_v7 = vpop.permute.xlu1 %690 }
 0x212   : > { %v671_v8 = vpop.permute.xlu0 %670  ;;  %v651_v9 = vpop.permute.xlu1 %650 }
 0x216   : > { %v629_v10 = vpop.permute.xlu0 %628  ;;  %v609_v11 = vpop.permute.xlu1 %608 }
 0x217   : > { %v632_v33 = vsel %vm361_vm8, %v627_v4, %v629_v10  ;;  %v612_v35 = vsel %vm340_vm9, %v607_v5, %v609_v11 }
 0x21a   : > { %v591_v12 = vpop.permute.xlu0 %590  ;;  %v711_v14 = vpop.permute.xlu1 %710 }
 0x21b   : > { %v715_v16 = vsel %vm447_vm0, %v711_v14, %v713_v1  ;;  %v714_v17 = vsel %vm447_vm0, %v709_v6, %v711_v14 }
 0x21c   : > { %938 = vmatprep.subr.msk.mxu1 %vm1320_vm1, %v715_v16 }
 0x21d   : > { %939 = vmatpush1.msk.msra.mxu1 %vm1324_vm2, %v714_v17 }
 0x21e   : > { %v673_v0 = vpop.permute.xlu0 %672  ;;  %v693_v18 = vpop.permute.xlu1 %692 }
 0x21f   : > { %v697_v19 = vsel %vm428_vm3, %v693_v18, %v695_v63  ;;  %v696_v20 = vsel %vm428_vm3, %v691_v7, %v693_v18  ;;  %v677_v21 = vsel %vm407_vm4, %v673_v0, %v675_v3  ;;  %v676_v22 = vsel %vm407_vm4, %v671_v8, %v673_v0 }
 0x220   : > { %764 = vmatprep.subr.mxu1 %v697_v19 }
 0x221   : > { %765 = vmatpush1.msra.mxu1 %v696_v20 }
 0x222   : > { %v589_v23 = vpop.permute.xlu0 %588  ;;  %940 = vmatprep.subr.msk.mxu1 %vm1336_vm5, %v677_v21  ;;  %v571_v25 = vpop.permute.xlu1 %570 }
 0x223   : > { %941 = vmatpush1.msk.msra.mxu1 %vm1340_vm6, %v676_v22  ;;  %v594_v39 = vsel %vm317_vm10, %v589_v23, %v591_v12 }
 0x226   : > { %v653_v27 = vpop.permute.xlu1 %652  ;;  %v611_v30 = vpop.permute.xlu0 %610 }
 0x227   : > { %v656_v28 = vsel %vm386_vm7, %v651_v9, %v653_v27  ;;  %v657_v29 = vsel %vm386_vm7, %v653_v27, %v655_v2  ;;  %v613_v34 = vsel %vm340_vm9, %v609_v11, %v611_v30 }
 0x228   : > { %942 = vmatprep.subr.msk.mxu1 %vm1320_vm1, %v657_v29 }
 0x229   : > { %943 = vmatpush1.msk.msra.mxu1 %vm1324_vm2, %v656_v28 }
 0x22a   : > { %770 = vmatprep.subr.mxu1 %v555_v61  ;;  %v631_v31 = vpop.permute.xlu1 %630  ;;  %v573_v36 = vpop.permute.xlu0 %572 }
 0x22b   : > { %v633_v32 = vsel %vm361_vm8, %v629_v10, %v631_v31  ;;  %771 = vmatpush1.msra.mxu1 %v1382_v58  ;;  %v575_v40 = vsel %vm296_vm11, %v571_v25, %v573_v36 }
 0x22c   : > { %944 = vmatprep.subr.msk.mxu1 %vm1336_vm5, %v633_v32 }
 0x22d   : > { %945 = vmatpush1.msk.msra.mxu1 %vm1340_vm6, %v632_v33 }
 0x22e   : > { %946 = vmatprep.subr.msk.mxu1 %vm1320_vm1, %v613_v34  ;;  %v593_v37 = vpop.permute.xlu1 %592 }
 0x22f   : > { %947 = vmatpush1.msk.msra.mxu1 %vm1324_vm2, %v612_v35  ;;  %v595_v38 = vsel %vm317_vm10, %v591_v12, %v593_v37 }
 0x230   : > { %776 = vmatprep.subr.mxu1 %v595_v38 }
 0x231   : > { %777 = vmatpush1.msra.mxu1 %v594_v39 }
 0x232   : > { %948 = vmatprep.subr.msk.mxu1 %vm1336_vm5, %v575_v40  ;;  %v569_v41 = vpop.permute.xlu1 %568 }
 0x233   : > { %v574_v15 = vsel %vm296_vm11, %v569_v41, %v571_v25 }
 0x234   : > { %949 = vmatpush1.msk.msra.mxu1 %vm1340_vm6, %v574_v15 }
 0x235   : > { %918 = vmatmul.mubr.msk.f32.vlgmr.msra.gmra.mxu1 %vm479_vm12, %v556_v13 }
 0x237   : > { %v743_v42 = vpop.permute.xlu0 %742 }
 0x2f5   : > { %v814_v43 = vpop.f32.mrf.mxu1 }
 0x2f6   : > { %v815_v44 = vadd.f32 %v814_v43, %v743_v42 }
 0x2f7   : > { %v816_v45 = vpop.f32.mrf.mxu1 }
 0x2f8   : > { %v819_v24 = vmax.f32 %v815_v44, 0.0  ;;  %v817_v46 = vadd.f32 %v816_v45, %v743_v42 }
 0x2fa   : > { %821 = vst [vmem:[%s240_s16] sm:$0xff] %v819_v24  ;;  %v820_v47 = vmax.f32 %v817_v46, 0.0 }
 0x2fc   : > { %822 = vst [vmem:[%s240_s16 + $0x8] sm:$0xff] %v820_v47 }
 0x2fd   : > { %1048 = shalt.err (!%p1045_p10)
}
 0x2fe   : > { %s1049_s11 = scalar_lea.hbm %s836_s8, 256  ;;  %s1053_s15 = scalar_lea.hbm %s1502_s5, 512 }
 0x2ff   : > { %p1050_p2 = scmp.ne.s32.totalorder %s836_s8, %s1049_s11  ;;  %p1054_p7 = scmp.lt.s32.totalorder %s836_s8, %s1502_s5 }
 0x300   : > { %p1055_p0 = scmp.lt.s32.totalorder %s1053_s15, %s1049_s11 }
 0x301   : > { %p1051_p4 = pnand %p1050_p2, %p1521_p12 }
 0x302   : > { %p1056_p6 = por %p1055_p0, %p1054_p7 }
 0x303   : > { %p1052_p9 = pneg %p1051_p4 }
 0x305   : > { %p1057_p11 = pnand %p1056_p6, %p1052_p9 }
 0x307   : > { %1060 = shalt.err (!%p1057_p11)
}
 0x308   : > { %952 = dma.vmem_to_hbm [thread:$0]  (%p1521_p12), %s839_s25, 256, %s836_s8, %s824_s7  }
 0x309 PF: > { %s850_s29 = sand.u32 1, %s1087_s18   ;;  %p1522_p13 = scmp.ne.s32.totalorder %s1508_s6, 0 }
 0x30a   : > { %p1523_p1 = scmp.ge.s32.totalorder %s1099_s21, 2  ;;  %s851_s16 = scalar_lea.sflag [#allocation7], %s850_s29 }
 0x30c   : > { %p959_p3 = pnand %p1523_p1, %p1522_p13 }
 0x30e   : > { %p960_p5 = pneg %p959_p3 }
 0x310   : > { %1082 = dma.done.wait (%p960_p5), %s851_s16, 256  }
 0x311   : > { %1084 = vsyncadd (%p960_p5), %s851_s16, 4294967040  ;;  %p18_p8 = scmp.ge.s32.totalorder %s1168_s24, 4   ;;  %s1524_s18 = smov %s1091_s19 }
 0x312   : > { %s1525_s19 = smov %s1095_s20  ;;  %s1526_s20 = smov %s1180_s27 }
 0x313   : > { %s1527_s21 = smov %s1168_s24  ;;  %20 = sbr.rel (!%p18_p8) target bundleno = 5 (0x5), region = 85 }
 0x318   :  { %856 = vsyncpa [#allocation6], 1 }
 0x319   :  { %858 = vsyncpa [#allocation6 + $0x1], 1 }
 0x31a   :  { %859 = vsyncpa [#allocation7], 1 }
 0x31b   :  { %861 = vsyncpa [#allocation7 + $0x1], 1 }

</bundles_post_ra>
